<compile_context>
chip_gen: v7x
topology: tpu7x:2x2x1
jax: 0.10.0
libtpu: 0.0.40
codegen_flags: <defaults>
</compile_context>

<pallas_src>
import functools

import jax
import jax.numpy as jnp
from jax.experimental import pallas as pl
from jax.experimental.pallas import tpu as pltpu


_LANE = 128
_FUSED_VMEM_BUDGET = 40 * 1024 * 1024   # leave headroom under the scoped limit


def _round_up(a, b):
    return -(-a // b) * b


def _sublane_multiple(dtype):
    # min second-minor tile: 8 for 4-byte, 16 for 2-byte, 32 for 1-byte dtypes
    return {4: 8, 2: 16, 1: 32}.get(jnp.dtype(dtype).itemsize, 8)


def _padded_bytes(rows, lanes, dtype):
    """VMEM footprint of a (rows, lanes) tile after (sublane, 128) padding."""
    return (_round_up(rows, _sublane_multiple(dtype))
            * _round_up(lanes, _LANE) * jnp.dtype(dtype).itemsize)


@functools.lru_cache(maxsize=1)
def _vmem_limit_bytes():
    """Scoped VMEM limit: generous but always below physical capacity."""
    try:
        cap = int(pltpu.get_tpu_info().vmem_capacity_bytes)
    except Exception:  # conservative fallback if the query is unavailable
        cap = 64 * 1024 * 1024
    return min(48 * 1024 * 1024, (cap * 3) // 4)


def _pool_expand_matrices(H, W):
    """Constant selection matrices (built once in the wrapper, f32, exact).

    P  (H*W, H+W): x(C, HW) @ P  -> [mean over W per row | mean over H per col]
    Eh (H,  H*W): oh(C, H) @ Eh -> per-row gate broadcast to every (h, w)
    Ew (W,  H*W): ow(C, W) @ Ew -> per-col gate broadcast to every (h, w)
    """
    k = jnp.arange(H * W)
    h_of_k = k // W
    w_of_k = k % W
    eh = (h_of_k[None, :] == jnp.arange(H)[:, None]).astype(jnp.float32)
    ew = (w_of_k[None, :] == jnp.arange(W)[:, None]).astype(jnp.float32)
    pool = jnp.concatenate([eh.T / W, ew.T / H], axis=1)
    return pool, eh, ew


def _param_args(params):
    f32 = jnp.float32
    col = lambda a: a.reshape(-1, 1).astype(f32)
    return (params["w1"].astype(f32), col(params["b1"]),
            col(params["bn_gamma"]), col(params["bn_beta"]),
            col(params["bn_mean"]), col(params["bn_var"]),
            params["w2"].astype(f32), col(params["b2"]),
            params["w3"].astype(f32), col(params["b3"]))


# ---------------------------------------------------------------------------
# Shared in-kernel math: conv1(1x1) + BN(eval) + h_swish + conv2/3 + sigmoid.
# ---------------------------------------------------------------------------
def _squeeze_transform(xc, w1, b1, gamma, beta, mean, var,
                       w2, b2, w3, b3, H):
    f32 = jnp.float32
    z = jnp.dot(w1, xc, preferred_element_type=f32) + b1          # (tc, H+W)
    z = (z - mean) * jax.lax.rsqrt(var + 1e-5) * gamma + beta     # BN eval
    z = z * (jnp.clip(z + 3.0, 0.0, 6.0) * (1.0 / 6.0))           # h_swish fused
    lh = jnp.dot(w2, z[:, :H], preferred_element_type=f32) + b2   # (C, H)
    lw = jnp.dot(w3, z[:, H:], preferred_element_type=f32) + b3   # (C, W)
    return 1.0 / (1.0 + jnp.exp(-lh)), 1.0 / (1.0 + jnp.exp(-lw))


# ---------------------------------------------------------------------------
# Fused single-kernel path: pool + transform + gate, one read / one write of x.
# ---------------------------------------------------------------------------
def _fused_kernel(x_ref, pool_ref, eh_ref, ew_ref,
                  w1_ref, b1_ref, g_ref, be_ref, mu_ref, var_ref,
                  w2_ref, b2_ref, w3_ref, b3_ref, o_ref, *, H):
    f32 = jnp.float32
    x = x_ref[0].astype(f32)                                        # (C, H*W)
    # Coordinate pooling as one lane-dense MXU matmul (no in-kernel reshape).
    xc = jnp.dot(x, pool_ref[...], preferred_element_type=f32)     # (C, H+W)
    oh, ow = _squeeze_transform(xc, w1_ref[...], b1_ref[...], g_ref[...],
                                be_ref[...], mu_ref[...], var_ref[...],
                                w2_ref[...], b2_ref[...], w3_ref[...],
                                b3_ref[...], H)
    gate = (jnp.dot(oh, eh_ref[...], preferred_element_type=f32)
            * jnp.dot(ow, ew_ref[...], preferred_element_type=f32))  # (C, H*W)
    o_ref[0] = (x * gate).astype(o_ref.dtype)


def _coord_attention_fused(x2d, params, H, W):
    N, C, HW = x2d.shape
    tc = params["w1"].shape[0]
    pool, eh, ew = _pool_expand_matrices(H, W)
    p_args = _param_args(params)

    def const(shape):
        return pl.BlockSpec(shape, lambda n: (0,) * len(shape))

    in_specs = [pl.BlockSpec((1, C, HW), lambda n: (n, 0, 0)),
                const(pool.shape), const(eh.shape), const(ew.shape),
                const((tc, C)), const((tc, 1)), const((tc, 1)), const((tc, 1)),
                const((tc, 1)), const((tc, 1)),
                const((C, tc)), const((C, 1)), const((C, tc)), const((C, 1))]

    x_bytes = x2d.size * x2d.dtype.itemsize
    cost = pl.CostEstimate(
        flops=int(6 * N * C * HW * (H + W) + 6 * N * C * HW),
        transcendentals=int(N * (C + tc) * (H + W)),
        bytes_accessed=int(2 * x_bytes))

    return pl.pallas_call(
        functools.partial(_fused_kernel, H=H),
        out_shape=jax.ShapeDtypeStruct((N, C, HW), x2d.dtype),
        grid=(N,),
        in_specs=in_specs,
        out_specs=pl.BlockSpec((1, C, HW), lambda n: (n, 0, 0)),
        compiler_params=pltpu.CompilerParams(
            dimension_semantics=("parallel",),
            vmem_limit_bytes=_vmem_limit_bytes()),
        cost_estimate=cost,
    )(x2d, pool, eh, ew, *p_args)


# ---------------------------------------------------------------------------
# Fallback 3-kernel path (channel tiled) for images too large to fuse.
# ---------------------------------------------------------------------------
def _pool_kernel(x_ref, pool_ref, xcat_ref):
    x = x_ref[0].astype(jnp.float32)                                # (ct, H*W)
    xcat_ref[0] = jnp.dot(x, pool_ref[...],
                          preferred_element_type=jnp.float32).astype(xcat_ref.dtype)


def _transform_kernel(xcat_ref, w1_ref, b1_ref, g_ref, be_ref, mu_ref, var_ref,
                      w2_ref, b2_ref, w3_ref, b3_ref, oh_ref, ow_ref, *, H):
    oh, ow = _squeeze_transform(
        xcat_ref[0].astype(jnp.float32),
        w1_ref[...], b1_ref[...], g_ref[...], be_ref[...], mu_ref[...],
        var_ref[...], w2_ref[...], b2_ref[...], w3_ref[...], b3_ref[...], H)
    oh_ref[0] = oh.astype(oh_ref.dtype)
    ow_ref[0] = ow.astype(ow_ref.dtype)


def _gate_kernel(x_ref, oh_ref, ow_ref, eh_ref, ew_ref, o_ref):
    f32 = jnp.float32
    gate = (jnp.dot(oh_ref[0].astype(f32), eh_ref[...], preferred_element_type=f32)
            * jnp.dot(ow_ref[0].astype(f32), ew_ref[...], preferred_element_type=f32))
    o_ref[0] = (x_ref[0].astype(f32) * gate).astype(o_ref.dtype)


def _pick_channel_tile(N, C, HW, dtype, target_bytes=4 * 1024 * 1024):
    """Largest channel tile whose PADDED block fits the budget, is a multiple
    of the dtype's sublane minimum, divides C, and keeps >=2 (ideally >=8)
    grid steps so both v7x TensorCores stay fed."""
    sm = _sublane_multiple(dtype)
    per_c = _round_up(HW, _LANE) * jnp.dtype(dtype).itemsize
    cands = [ct for ct in range(sm, C + 1, sm) if C % ct == 0]
    if not cands:
        return C  # C smaller than the sublane minimum: single full-C block
    fitting = [ct for ct in cands if ct * per_c <= target_bytes] or [cands[0]]
    for min_steps in (8, 2, 1):
        ok = [ct for ct in fitting if N * (C // ct) >= min_steps]
        if ok:
            return max(ok)
    return max(fitting)


def _coord_attention_tiled(x2d, params, H, W, ct):
    N, C, HW = x2d.shape
    tc = params["w1"].shape[0]
    f32 = jnp.float32
    pool, eh, ew = _pool_expand_matrices(H, W)
    p_args = _param_args(params)
    x_bytes = x2d.size * x2d.dtype.itemsize
    vmem_limit = _vmem_limit_bytes()

    # 1. Coordinate pooling: one read of x, single tiny (N, C, H+W) output
    #    (no jnp.concatenate / extra HBM round trip of the pooled tensor).
    xcat = pl.pallas_call(
        _pool_kernel,
        out_shape=jax.ShapeDtypeStruct((N, C, H + W), f32),
        grid=(N, C // ct),
        in_specs=[pl.BlockSpec((1, ct, HW), lambda n, c: (n, c, 0)),
                  pl.BlockSpec(pool.shape, lambda n, c: (0, 0))],
        out_specs=pl.BlockSpec((1, ct, H + W), lambda n, c: (n, c, 0)),
        compiler_params=pltpu.CompilerParams(
            dimension_semantics=("parallel", "parallel"),
            vmem_limit_bytes=vmem_limit),
        cost_estimate=pl.CostEstimate(flops=int(2 * N * C * HW * (H + W)),
                                      transcendentals=0,
                                      bytes_accessed=int(x_bytes)),
    )(x2d, pool)

    # 2. Tiny per-image squeeze transform (independent per n -> "parallel").
    def const(shape):
        return pl.BlockSpec(shape, lambda n: (0,) * len(shape))

    oh, ow = pl.pallas_call(
        functools.partial(_transform_kernel, H=H),
        out_shape=(jax.ShapeDtypeStruct((N, C, H), f32),
                   jax.ShapeDtypeStruct((N, C, W), f32)),
        grid=(N,),
        in_specs=[pl.BlockSpec((1, C, H + W), lambda n: (n, 0, 0)),
                  const((tc, C)), const((tc, 1)), const((tc, 1)),
                  const((tc, 1)), const((tc, 1)), const((tc, 1)),
                  const((C, tc)), const((C, 1)), const((C, tc)), const((C, 1))],
        out_specs=(pl.BlockSpec((1, C, H), lambda n: (n, 0, 0)),
                   pl.BlockSpec((1, C, W), lambda n: (n, 0, 0))),
        compiler_params=pltpu.CompilerParams(
            dimension_semantics=("parallel",)),
    )(xcat, *p_args)

    # 3. Fused gating multiply: one read of x + tiny gates, one write of out.
    out = pl.pallas_call(
        _gate_kernel,
        out_shape=jax.ShapeDtypeStruct((N, C, HW), x2d.dtype),
        grid=(N, C // ct),
        in_specs=[pl.BlockSpec((1, ct, HW), lambda n, c: (n, c, 0)),
                  pl.BlockSpec((1, ct, H), lambda n, c: (n, c, 0)),
                  pl.BlockSpec((1, ct, W), lambda n, c: (n, c, 0)),
                  pl.BlockSpec(eh.shape, lambda n, c: (0, 0)),
                  pl.BlockSpec(ew.shape, lambda n, c: (0, 0))],
        out_specs=pl.BlockSpec((1, ct, HW), lambda n, c: (n, c, 0)),
        compiler_params=pltpu.CompilerParams(
            dimension_semantics=("parallel", "parallel"),
            vmem_limit_bytes=vmem_limit),
        cost_estimate=pl.CostEstimate(
            flops=int(4 * N * C * HW * (H + W) + 2 * N * C * HW),
            transcendentals=0,
            bytes_accessed=int(2 * x_bytes)),
    )(x2d, oh, ow, eh, ew)
    return out


# ---------------------------------------------------------------------------
# Top-level orchestration
# ---------------------------------------------------------------------------
def _fused_fits(N, C, H, W, dtype):
    HW = H * W
    x_blk = _padded_bytes(C, HW, dtype)
    f32_blk = _padded_bytes(C, HW, jnp.float32)
    const_b = (_padded_bytes(HW, H + W, jnp.float32)
               + _padded_bytes(H, HW, jnp.float32)
               + _padded_bytes(W, HW, jnp.float32))
    # double-buffered in + out, ~3 live full-size f32 temporaries, constants.
    need = 4 * x_blk + 3 * f32_blk + 2 * const_b + (2 << 20)
    return need <= _FUSED_VMEM_BUDGET


def coord_attention(x, params, *, force_path=None):
    """CoordAttention forward (inference). x: (N, C, H, W); out_channels == C.

    force_path: None (auto), "fused" or "tiled".
    """
    N, C, H, W = x.shape
    assert params["w2"].shape[0] == C, "out_channels must equal in_channels"
    HW = H * W
    x2d = x.reshape(N, C, HW)   # free (row-major contiguous) -> lane dense
    if force_path is None:
        use_fused = _fused_fits(N, C, H, W, x.dtype)
    else:
        use_fused = force_path == "fused"
    # TODO(synk): add spatial (H*W) tiling with strided-add pooling for extreme
    # H*W, where the (H*W, H+W) selection-matrix matmuls stop being negligible.
    if use_fused:
        out2d = _coord_attention_fused(x2d, params, H, W)
    else:
        ct = _pick_channel_tile(N, C, HW, x.dtype)
        out2d = _coord_attention_tiled(x2d, params, H, W, ct)
    return out2d.reshape(N, C, H, W)


# ---------------------------------------------------------------------------
# Pure-JAX reference (mirrors the torch forward exactly) + demo
# ---------------------------------------------------------------------------
def _coord_attention_ref(x, p):
    hp = jax.lax.Precision.HIGHEST
    N, C, H, W = x.shape
    x_h = jnp.mean(x, axis=3)                                   # (N, C, H)
    x_w = jnp.mean(x, axis=2)                                   # (N, C, W)
    xc = jnp.concatenate([x_h, x_w], axis=2)                    # (N, C, H+W)
    z = jnp.einsum("oc,nck->nok", p["w1"], xc, precision=hp) + p["b1"][None, :, None]
    z = (z - p["bn_mean"][None, :, None]) / jnp.sqrt(p["bn_var"][None, :, None] + 1e-5)
    z = z * p["bn_gamma"][None, :, None] + p["bn_beta"][None, :, None]
    z = z * jnp.clip(z + 3.0, 0.0, 6.0) / 6.0                   # h_swish
    oh = jax.nn.sigmoid(jnp.einsum("oc,nch->noh", p["w2"], z[:, :, :H], precision=hp)
                        + p["b2"][None, :, None])
    ow = jax.nn.sigmoid(jnp.einsum("oc,ncw->now", p["w3"], z[:, :, H:], precision=hp)
                        + p["b3"][None, :, None])
    return x * ow[:, :, None, :] * oh[:, :, :, None]


if __name__ == "__main__":
    key = jax.random.PRNGKey(0)
    ks = jax.random.split(key, 11)

    N, C, H, W = 2, 4, 16, 16
    reduction = 32
    tc = max(8, C // reduction)          # temp_c = 8

    x = jax.random.normal(ks[0], (N, C, H, W), dtype=jnp.float32) * 2.0
    params = {
        "w1": jax.random.normal(ks[1], (tc, C), jnp.float32) * 0.5,
        "b1": jax.random.normal(ks[2], (tc,), jnp.float32) * 0.1,
        "bn_gamma": 1.0 + 0.1 * jax.random.normal(ks[3], (tc,), jnp.float32),
        "bn_beta": 0.1 * jax.random.normal(ks[4], (tc,), jnp.float32),
        "bn_mean": 0.1 * jax.random.normal(ks[5], (tc,), jnp.float32),
        "bn_var": 0.5 + jnp.abs(jax.random.normal(ks[6], (tc,), jnp.float32)),
        "w2": jax.random.normal(ks[7], (C, tc), jnp.float32) * 0.5,
        "b2": jax.random.normal(ks[8], (C,), jnp.float32) * 0.1,
        "w3": jax.random.normal(ks[9], (C, tc), jnp.float32) * 0.5,
        "b3": jax.random.normal(ks[10], (C,), jnp.float32) * 0.1,
    }

    ref = _coord_attention_ref(x, params)

    # Fused single-kernel path (auto-selected at this size).
    out = jax.block_until_ready(coord_attention(x, params))
    assert out.shape == x.shape and out.dtype == x.dtype
    err = float(jnp.max(jnp.abs(out - ref)))
    assert err < 2e-3, f"fused path max abs err {err}"

    # Tiled 3-kernel fallback path (exercised explicitly for coverage).
    out_t = jax.block_until_ready(coord_attention(x, params, force_path="tiled"))
    err_t = float(jnp.max(jnp.abs(out_t - ref)))
    assert err_t < 2e-3, f"tiled path max abs err {err_t}"

    print("KERNEL_OK")
</pallas_src>

<mosaic_0001>
module attributes {stable_mosaic.version = 11 : i64} {
  func.func @_fused_kernel(%arg0: i32, %arg1: memref<1x4x256xf32, #tpu.memory_space<vmem>>, %arg2: memref<256x32xf32, #tpu.memory_space<vmem>>, %arg3: memref<16x256xf32, #tpu.memory_space<vmem>>, %arg4: memref<16x256xf32, #tpu.memory_space<vmem>>, %arg5: memref<8x4xf32, #tpu.memory_space<vmem>>, %arg6: memref<8x1xf32, #tpu.memory_space<vmem>>, %arg7: memref<8x1xf32, #tpu.memory_space<vmem>>, %arg8: memref<8x1xf32, #tpu.memory_space<vmem>>, %arg9: memref<8x1xf32, #tpu.memory_space<vmem>>, %arg10: memref<8x1xf32, #tpu.memory_space<vmem>>, %arg11: memref<4x8xf32, #tpu.memory_space<vmem>>, %arg12: memref<4x1xf32, #tpu.memory_space<vmem>>, %arg13: memref<4x8xf32, #tpu.memory_space<vmem>>, %arg14: memref<4x1xf32, #tpu.memory_space<vmem>>, %arg15: memref<1x4x256xf32, #tpu.memory_space<vmem>>) attributes {dimension_semantics = [#tpu.dimension_semantics<parallel>], iteration_bounds = array<i64: 2>, scalar_prefetch = 0 : i64, scratch_operands = 0 : i64, tpu.core_type = #tpu.core_type<tc>, window_params = [{transform_indices = @transform_0, window_bounds = array<i64: 1, 4, 256>}, {pipeline_mode = #tpu.pipeline_mode<synchronous>, transform_indices = @transform_1, window_bounds = array<i64: 256, 32>}, {pipeline_mode = #tpu.pipeline_mode<synchronous>, transform_indices = @transform_2, window_bounds = array<i64: 16, 256>}, {pipeline_mode = #tpu.pipeline_mode<synchronous>, transform_indices = @transform_3, window_bounds = array<i64: 16, 256>}, {pipeline_mode = #tpu.pipeline_mode<synchronous>, transform_indices = @transform_4, window_bounds = array<i64: 8, 4>}, {pipeline_mode = #tpu.pipeline_mode<synchronous>, transform_indices = @transform_5, window_bounds = array<i64: 8, 1>}, {pipeline_mode = #tpu.pipeline_mode<synchronous>, transform_indices = @transform_6, window_bounds = array<i64: 8, 1>}, {pipeline_mode = #tpu.pipeline_mode<synchronous>, transform_indices = @transform_7, window_bounds = array<i64: 8, 1>}, {pipeline_mode = #tpu.pipeline_mode<synchronous>, transform_indices = @transform_8, window_bounds = array<i64: 8, 1>}, {pipeline_mode = #tpu.pipeline_mode<synchronous>, transform_indices = @transform_9, window_bounds = array<i64: 8, 1>}, {pipeline_mode = #tpu.pipeline_mode<synchronous>, transform_indices = @transform_10, window_bounds = array<i64: 4, 8>}, {pipeline_mode = #tpu.pipeline_mode<synchronous>, transform_indices = @transform_11, window_bounds = array<i64: 4, 1>}, {pipeline_mode = #tpu.pipeline_mode<synchronous>, transform_indices = @transform_12, window_bounds = array<i64: 4, 8>}, {pipeline_mode = #tpu.pipeline_mode<synchronous>, transform_indices = @transform_13, window_bounds = array<i64: 4, 1>}, {transform_indices = @transform_14, window_bounds = array<i64: 1, 4, 256>}]} {
    %c0 = arith.constant 0 : index
    %c0_0 = arith.constant 0 : index
    %c0_1 = arith.constant 0 : index
    %0 = vector.load %arg1[%c0, %c0_0, %c0_1] : memref<1x4x256xf32, #tpu.memory_space<vmem>>, vector<1x4x256xf32>
    %1 = vector.shape_cast %0 : vector<1x4x256xf32> to vector<4x256xf32>
    %c0_2 = arith.constant 0 : index
    %c0_3 = arith.constant 0 : index
    %2 = vector.load %arg2[%c0_2, %c0_3] : memref<256x32xf32, #tpu.memory_space<vmem>>, vector<256x32xf32>
    %cst = arith.constant dense<0.000000e+00> : vector<4x32xf32>
    %3 = tpu.matmul %1, %2, %cst {dimension_numbers = #tpu.dot_dimension_numbers<[1], [0], [0], [1], [0, 0, 1, 1], [], []>} : vector<4x256xf32>, vector<256x32xf32>, vector<4x32xf32> -> vector<4x32xf32>
    %c0_4 = arith.constant 0 : index
    %c0_5 = arith.constant 0 : index
    %4 = vector.load %arg5[%c0_4, %c0_5] : memref<8x4xf32, #tpu.memory_space<vmem>>, vector<8x4xf32>
    %c0_6 = arith.constant 0 : index
    %c0_7 = arith.constant 0 : index
    %5 = vector.load %arg6[%c0_6, %c0_7] : memref<8x1xf32, #tpu.memory_space<vmem>>, vector<8x1xf32>
    %c0_8 = arith.constant 0 : index
    %c0_9 = arith.constant 0 : index
    %6 = vector.load %arg7[%c0_8, %c0_9] : memref<8x1xf32, #tpu.memory_space<vmem>>, vector<8x1xf32>
    %c0_10 = arith.constant 0 : index
    %c0_11 = arith.constant 0 : index
    %7 = vector.load %arg8[%c0_10, %c0_11] : memref<8x1xf32, #tpu.memory_space<vmem>>, vector<8x1xf32>
    %c0_12 = arith.constant 0 : index
    %c0_13 = arith.constant 0 : index
    %8 = vector.load %arg9[%c0_12, %c0_13] : memref<8x1xf32, #tpu.memory_space<vmem>>, vector<8x1xf32>
    %c0_14 = arith.constant 0 : index
    %c0_15 = arith.constant 0 : index
    %9 = vector.load %arg10[%c0_14, %c0_15] : memref<8x1xf32, #tpu.memory_space<vmem>>, vector<8x1xf32>
    %c0_16 = arith.constant 0 : index
    %c0_17 = arith.constant 0 : index
    %10 = vector.load %arg11[%c0_16, %c0_17] : memref<4x8xf32, #tpu.memory_space<vmem>>, vector<4x8xf32>
    %c0_18 = arith.constant 0 : index
    %c0_19 = arith.constant 0 : index
    %11 = vector.load %arg12[%c0_18, %c0_19] : memref<4x1xf32, #tpu.memory_space<vmem>>, vector<4x1xf32>
    %c0_20 = arith.constant 0 : index
    %c0_21 = arith.constant 0 : index
    %12 = vector.load %arg13[%c0_20, %c0_21] : memref<4x8xf32, #tpu.memory_space<vmem>>, vector<4x8xf32>
    %c0_22 = arith.constant 0 : index
    %c0_23 = arith.constant 0 : index
    %13 = vector.load %arg14[%c0_22, %c0_23] : memref<4x1xf32, #tpu.memory_space<vmem>>, vector<4x1xf32>
    %cst_24 = arith.constant dense<0.000000e+00> : vector<8x32xf32>
    %14 = tpu.matmul %4, %3, %cst_24 {dimension_numbers = #tpu.dot_dimension_numbers<[1], [0], [0], [1], [0, 0, 1, 1], [], []>} : vector<8x4xf32>, vector<4x32xf32>, vector<8x32xf32> -> vector<8x32xf32>
    %15 = vector.broadcast %5 : vector<8x1xf32> to vector<8x32xf32>
    %16 = arith.addf %14, %15 : vector<8x32xf32>
    %17 = vector.broadcast %8 : vector<8x1xf32> to vector<8x32xf32>
    %18 = arith.subf %16, %17 : vector<8x32xf32>
    %cst_25 = arith.constant 9.99999974E-6 : f32
    %19 = vector.broadcast %cst_25 : f32 to vector<8x1xf32>
    %20 = arith.addf %9, %19 : vector<8x1xf32>
    %21 = math.rsqrt %20 : vector<8x1xf32>
    %22 = vector.broadcast %21 : vector<8x1xf32> to vector<8x32xf32>
    %23 = arith.mulf %18, %22 : vector<8x32xf32>
    %24 = vector.broadcast %6 : vector<8x1xf32> to vector<8x32xf32>
    %25 = arith.mulf %23, %24 : vector<8x32xf32>
    %26 = vector.broadcast %7 : vector<8x1xf32> to vector<8x32xf32>
    %27 = arith.addf %25, %26 : vector<8x32xf32>
    %cst_26 = arith.constant 3.000000e+00 : f32
    %28 = vector.broadcast %cst_26 : f32 to vector<8x32xf32>
    %29 = arith.addf %27, %28 : vector<8x32xf32>
    %cst_27 = arith.constant 0.000000e+00 : f32
    %cst_28 = arith.constant 6.000000e+00 : f32
    %30 = vector.broadcast %cst_27 : f32 to vector<8x32xf32>
    %31 = arith.maximumf %30, %29 : vector<8x32xf32>
    %32 = vector.broadcast %cst_28 : f32 to vector<8x32xf32>
    %33 = arith.minimumf %32, %31 : vector<8x32xf32>
    %cst_29 = arith.constant 0.166666672 : f32
    %34 = vector.broadcast %cst_29 : f32 to vector<8x32xf32>
    %35 = arith.mulf %33, %34 : vector<8x32xf32>
    %36 = arith.mulf %27, %35 : vector<8x32xf32>
    %37 = vector.extract_strided_slice %36 {offsets = [0, 0], sizes = [8, 16], strides = [1, 1]} : vector<8x32xf32> to vector<8x16xf32>
    %cst_30 = arith.constant dense<0.000000e+00> : vector<4x16xf32>
    %38 = tpu.matmul %10, %37, %cst_30 {dimension_numbers = #tpu.dot_dimension_numbers<[1], [0], [0], [1], [0, 0, 1, 1], [], []>} : vector<4x8xf32>, vector<8x16xf32>, vector<4x16xf32> -> vector<4x16xf32>
    %39 = vector.broadcast %11 : vector<4x1xf32> to vector<4x16xf32>
    %40 = arith.addf %38, %39 : vector<4x16xf32>
    %41 = vector.extract_strided_slice %36 {offsets = [0, 16], sizes = [8, 16], strides = [1, 1]} : vector<8x32xf32> to vector<8x16xf32>
    %cst_31 = arith.constant dense<0.000000e+00> : vector<4x16xf32>
    %42 = tpu.matmul %12, %41, %cst_31 {dimension_numbers = #tpu.dot_dimension_numbers<[1], [0], [0], [1], [0, 0, 1, 1], [], []>} : vector<4x8xf32>, vector<8x16xf32>, vector<4x16xf32> -> vector<4x16xf32>
    %43 = vector.broadcast %13 : vector<4x1xf32> to vector<4x16xf32>
    %44 = arith.addf %42, %43 : vector<4x16xf32>
    %cst_32 = arith.constant 0.000000e+00 : f32
    %45 = vector.broadcast %cst_32 : f32 to vector<4x16xf32>
    %46 = arith.subf %45, %40 : vector<4x16xf32>
    %47 = math.exp %46 : vector<4x16xf32>
    %cst_33 = arith.constant 1.000000e+00 : f32
    %48 = vector.broadcast %cst_33 : f32 to vector<4x16xf32>
    %49 = arith.addf %48, %47 : vector<4x16xf32>
    %cst_34 = arith.constant 1.000000e+00 : f32
    %50 = vector.broadcast %cst_34 : f32 to vector<4x16xf32>
    %51 = arith.divf %50, %49 : vector<4x16xf32>
    %cst_35 = arith.constant 0.000000e+00 : f32
    %52 = vector.broadcast %cst_35 : f32 to vector<4x16xf32>
    %53 = arith.subf %52, %44 : vector<4x16xf32>
    %54 = math.exp %53 : vector<4x16xf32>
    %cst_36 = arith.constant 1.000000e+00 : f32
    %55 = vector.broadcast %cst_36 : f32 to vector<4x16xf32>
    %56 = arith.addf %55, %54 : vector<4x16xf32>
    %cst_37 = arith.constant 1.000000e+00 : f32
    %57 = vector.broadcast %cst_37 : f32 to vector<4x16xf32>
    %58 = arith.divf %57, %56 : vector<4x16xf32>
    %c0_38 = arith.constant 0 : index
    %c0_39 = arith.constant 0 : index
    %59 = vector.load %arg3[%c0_38, %c0_39] : memref<16x256xf32, #tpu.memory_space<vmem>>, vector<16x256xf32>
    %cst_40 = arith.constant dense<0.000000e+00> : vector<4x256xf32>
    %60 = tpu.matmul %51, %59, %cst_40 {dimension_numbers = #tpu.dot_dimension_numbers<[1], [0], [0], [1], [0, 0, 1, 1], [], []>} : vector<4x16xf32>, vector<16x256xf32>, vector<4x256xf32> -> vector<4x256xf32>
    %c0_41 = arith.constant 0 : index
    %c0_42 = arith.constant 0 : index
    %61 = vector.load %arg4[%c0_41, %c0_42] : memref<16x256xf32, #tpu.memory_space<vmem>>, vector<16x256xf32>
    %cst_43 = arith.constant dense<0.000000e+00> : vector<4x256xf32>
    %62 = tpu.matmul %58, %61, %cst_43 {dimension_numbers = #tpu.dot_dimension_numbers<[1], [0], [0], [1], [0, 0, 1, 1], [], []>} : vector<4x16xf32>, vector<16x256xf32>, vector<4x256xf32> -> vector<4x256xf32>
    %63 = arith.mulf %60, %62 : vector<4x256xf32>
    %64 = arith.mulf %1, %63 : vector<4x256xf32>
    %c0_44 = arith.constant 0 : index
    %c0_45 = arith.constant 0 : index
    %c0_46 = arith.constant 0 : index
    %65 = vector.load %arg15[%c0_44, %c0_45, %c0_46] : memref<1x4x256xf32, #tpu.memory_space<vmem>>, vector<1x4x256xf32>
    %66 = vector.shape_cast %65 : vector<1x4x256xf32> to vector<4x256xf32>
    %67 = vector.shape_cast %64 : vector<4x256xf32> to vector<1x4x256xf32>
    tpu.vector_store %arg15[%c0_44, %c0_45, %c0_46], %67 {strides = array<i32>} : memref<1x4x256xf32, #tpu.memory_space<vmem>>, vector<1x4x256xf32>,
    return
  }
  func.func @transform_0(%arg0: i32) -> (i32, i32, i32) {
    %c0_i32 = arith.constant 0 : i32
    %c0_i32_0 = arith.constant 0 : i32
    %c0_i32_1 = arith.constant 0 : i32
    return %arg0, %c0_i32, %c0_i32_0 : i32, i32, i32
  }
  func.func @transform_1(%arg0: i32) -> (i32, i32) {
    %c0_i32 = arith.constant 0 : i32
    %c0_i32_0 = arith.constant 0 : i32
    %c0_i32_1 = arith.constant 0 : i32
    return %c0_i32, %c0_i32_0 : i32, i32
  }
  func.func @transform_2(%arg0: i32) -> (i32, i32) {
    %c0_i32 = arith.constant 0 : i32
    %c0_i32_0 = arith.constant 0 : i32
    %c0_i32_1 = arith.constant 0 : i32
    return %c0_i32, %c0_i32_0 : i32, i32
  }
  func.func @transform_3(%arg0: i32) -> (i32, i32) {
    %c0_i32 = arith.constant 0 : i32
    %c0_i32_0 = arith.constant 0 : i32
    %c0_i32_1 = arith.constant 0 : i32
    return %c0_i32, %c0_i32_0 : i32, i32
  }
  func.func @transform_4(%arg0: i32) -> (i32, i32) {
    %c0_i32 = arith.constant 0 : i32
    %c0_i32_0 = arith.constant 0 : i32
    %c0_i32_1 = arith.constant 0 : i32
    return %c0_i32, %c0_i32_0 : i32, i32
  }
  func.func @transform_5(%arg0: i32) -> (i32, i32) {
    %c0_i32 = arith.constant 0 : i32
    %c0_i32_0 = arith.constant 0 : i32
    %c0_i32_1 = arith.constant 0 : i32
    return %c0_i32, %c0_i32_0 : i32, i32
  }
  func.func @transform_6(%arg0: i32) -> (i32, i32) {
    %c0_i32 = arith.constant 0 : i32
    %c0_i32_0 = arith.constant 0 : i32
    %c0_i32_1 = arith.constant 0 : i32
    return %c0_i32, %c0_i32_0 : i32, i32
  }
  func.func @transform_7(%arg0: i32) -> (i32, i32) {
    %c0_i32 = arith.constant 0 : i32
    %c0_i32_0 = arith.constant 0 : i32
    %c0_i32_1 = arith.constant 0 : i32
    return %c0_i32, %c0_i32_0 : i32, i32
  }
  func.func @transform_8(%arg0: i32) -> (i32, i32) {
    %c0_i32 = arith.constant 0 : i32
    %c0_i32_0 = arith.constant 0 : i32
    %c0_i32_1 = arith.constant 0 : i32
    return %c0_i32, %c0_i32_0 : i32, i32
  }
  func.func @transform_9(%arg0: i32) -> (i32, i32) {
    %c0_i32 = arith.constant 0 : i32
    %c0_i32_0 = arith.constant 0 : i32
    %c0_i32_1 = arith.constant 0 : i32
    return %c0_i32, %c0_i32_0 : i32, i32
  }
  func.func @transform_10(%arg0: i32) -> (i32, i32) {
    %c0_i32 = arith.constant 0 : i32
    %c0_i32_0 = arith.constant 0 : i32
    %c0_i32_1 = arith.constant 0 : i32
    return %c0_i32, %c0_i32_0 : i32, i32
  }
  func.func @transform_11(%arg0: i32) -> (i32, i32) {
    %c0_i32 = arith.constant 0 : i32
    %c0_i32_0 = arith.constant 0 : i32
    %c0_i32_1 = arith.constant 0 : i32
    return %c0_i32, %c0_i32_0 : i32, i32
  }
  func.func @transform_12(%arg0: i32) -> (i32, i32) {
    %c0_i32 = arith.constant 0 : i32
    %c0_i32_0 = arith.constant 0 : i32
    %c0_i32_1 = arith.constant 0 : i32
    return %c0_i32, %c0_i32_0 : i32, i32
  }
  func.func @transform_13(%arg0: i32) -> (i32, i32) {
    %c0_i32 = arith.constant 0 : i32
    %c0_i32_0 = arith.constant 0 : i32
    %c0_i32_1 = arith.constant 0 : i32
    return %c0_i32, %c0_i32_0 : i32, i32
  }
  func.func @transform_14(%arg0: i32) -> (i32, i32, i32) {
    %c0_i32 = arith.constant 0 : i32
    %c0_i32_0 = arith.constant 0 : i32
    %c0_i32_1 = arith.constant 0 : i32
    return %arg0, %c0_i32, %c0_i32_0 : i32, i32, i32
  }
}

</mosaic_0001>

<bundles_post_ra>
// kernel: tpu_custom_call.1
= control target key start
LH: loop header
LB: loop body
LE: loop exit
PB: predicated region body
PF: predicated region fallthrough
CT: control target
= control target key end

     0   :  { %19 = vsyncpa [#allocation3], 0  ;;  %s1695_s0 = inlined_call_operand.vmem [shape: f32[2,4,256], index: 0, kind: input, shape index: {}]   ;;  %s1696_s1 = inlined_call_operand.vmem [shape: f32[256,32], index: 1, kind: input, shape index: {}]   ;;  %s1697_s2 = inlined_call_operand.vmem [shape: f32[16,256], index: 2, kind: input, shape index: {}]   ;;  %s1698_s3 = inlined_call_operand.vmem [shape: f32[16,256], index: 3, kind: input, shape index: {}]   ;;  %s1699_s4 = inlined_call_operand.vmem [shape: f32[8,4], index: 4, kind: input, shape index: {}]   ;;  %s1700_s5 = inlined_call_operand.vmem [shape: f32[8,1], index: 5, kind: input, shape index: {}]   ;;  %s1701_s6 = inlined_call_operand.vmem [shape: f32[8,1], index: 6, kind: input, shape index: {}]   ;;  %s1702_s7 = inlined_call_operand.vmem [shape: f32[8,1], index: 7, kind: input, shape index: {}]   ;;  %s1703_s8 = inlined_call_operand.vmem [shape: f32[8,1], index: 8, kind: input, shape index: {}]   ;;  %s1704_s9 = inlined_call_operand.vmem [shape: f32[8,1], index: 9, kind: input, shape index: {}]   ;;  %s1705_s10 = inlined_call_operand.vmem [shape: f32[4,8], index: 10, kind: input, shape index: {}]   ;;  %s1706_s11 = inlined_call_operand.vmem [shape: f32[4,1], index: 11, kind: input, shape index: {}]   ;;  %s1707_s12 = inlined_call_operand.vmem [shape: f32[4,8], index: 12, kind: input, shape index: {}]   ;;  %s1708_s13 = inlined_call_operand.vmem [shape: f32[4,1], index: 13, kind: input, shape index: {}]   ;;  %s1709_s14 = inlined_call_operand.hbm [shape: f32[2,4,256], index: 14, kind: output, shape index: {}]  }
   0x1   :  { %21 = vsyncpa [#allocation3 + $0x1], 0  ;;  %s1424_s29 = smov 0   ;;  %s1426_s30 = smov 0  }
   0x2   :  { %s1428_s15 = smov 0   ;;  %s1430_s16 = smov 0  }
   0x3 LB: > { %1715 = sst [smem:[#allocation5_spill]] %s1330_s29  ;;  %s1445_s17 = sadd.s32 4294967295, %s1342_s16   ;;  %s1342_s16 = sphi %s1430_s16, %s1724_s16   ;;  %s1338_s15 = sphi %s1428_s15, %s1726_s15   ;;  %s1334_s30 = sphi %s1426_s30, %s1728_s30   ;;  %s1330_s29 = sphi %s1424_s29, %s1727_s29  }
   0x4   : > { %1716 = sst [smem:[#allocation6_spill]] %s1338_s15  ;;  %s1108_s18 = sadd.s32 4294967294, %s1342_s16  }
   0x5   : > { %s1449_s19 = sadd.s32 1, %s1342_s16   ;;  %s333_s20 = sadd.s32 1, %s1338_s15 }
   0x6   : > { %1717 = sst [smem:[#allocation7_spill]] %s1449_s19  ;;  %s330_s21 = ssub.s32 %s1342_s16, %s1449_s19 }
   0x7   : > { %p343_p0 = scmp.ne.s32.totalorder %s1338_s15, %s1334_s30  ;;  %p331_p1 = scmp.eq.s32.totalorder %s330_s21, 0 }
   0x8   : > { %p344_p2 = scmp.eq.s32.totalorder %s1445_s17, 1  ;;  %p349_p3 = scmp.ne.s32.totalorder %s1334_s30, %s1330_s29 }
   0x9   : > { %p350_p4 = scmp.eq.s32.totalorder %s1108_s18, 1  ;;  %p1111_p7 = scmp.ge.s32.totalorder %s1342_s16, 1 }
   0xa   : > { %s1460_s22 = scalar_select %p331_p1, %s1338_s15, %s333_s20  }
   0xb   : > { %p1462_p5 = por %p344_p2, %p343_p0  ;;  %p1466_p6 = por %p350_p4, %p349_p3 }
   0xc   : > { %1718 = sst [smem:[#allocation8_spill]] %s1460_s22  ;;  %p415_p8 = scmp.lt.s32.totalorder %s1342_s16, 3 }
   0xd   : > { %s1720_s24 = scalar_select %p1466_p6, 1, 0 }
   0xe   : > { %p416_p9 = pnand %p1111_p7, %p415_p8 }
   0xf   : > { %1721 = sst [smem:[#allocation9_spill]] %s1720_s24  ;;  %v483_v0 = vld [vmem:[%s1696_s1 + $0x80] sm:$0xff] (!%p416_p9)  ;;  %v484_v1 = vld [vmem:[%s1696_s1 + $0x88] sm:$0xff] (!%p416_p9)  ;;  %p461_p10 = scmp.lt.s32.totalorder (!%p416_p9), %s1445_s17, 1  ;;  %v485_v5 = vld [vmem:[%s1696_s1 + $0x90] sm:$0xff] (!%p416_p9)  ;;  %v1344_v50 = vmov (!%p416_p9), 0.0  }
  0x10   : > { %419 = sbr.rel (%p416_p9) target bundleno = 1089 (0x441), region = 76  ;;  %v467_v2 = vld [vmem:[%s1696_s1] sm:$0xff] (!%p416_p9)  ;;  %v1184_v3 = vpack.c.bf16 (!%p416_p9), %v484_v1, %v483_v0  ;;  %v468_v4 = vld [vmem:[%s1696_s1 + $0x8] sm:$0xff] (!%p416_p9)  ;;  %v486_v6 = vld [vmem:[%s1696_s1 + $0x98] sm:$0xff] (!%p416_p9)  ;;  %1169 = vmatprep.subr.mxu1 (!%p416_p9), %v1344_v50  ;;  %vm1345_vm0 = vmmov (!%p416_p9), 0   ;;  %v1346_v52 = vmov (!%p416_p9), 0  }
  0x11   : > { %v1186_v7 = vpack.c.bf16 (!%p416_p9), %v468_v4, %v467_v2  ;;  %v1188_v8 = vpack.c.bf16 (!%p416_p9), %v486_v6, %v485_v5  ;;  %v469_v9 = vld [vmem:[%s1696_s1 + $0x10] sm:$0xff] (!%p416_p9)  ;;  %v470_v10 = vld [vmem:[%s1696_s1 + $0x18] sm:$0xff] (!%p416_p9)  ;;  %v487_v11 = vld [vmem:[%s1696_s1 + $0xa0] sm:$0xff] (!%p416_p9)  ;;  %1171 = vmatprep.mubr.msk.f32.mxu1 (!%p416_p9), %vm1345_vm0, %v1344_v50  ;;  %1267 = vset.pattern.permute.xlu0 (!%p416_p9), %v1346_v52  ;;  %vm591_vm1 = vcmask (!%p416_p9), 1043456   ;;  %vm587_vm2 = vcmask (!%p416_p9), 31744   ;;  %s1347_s20 = smov (!%p416_p9), 112  }
  0x12   : > { %1185 = vmatprep.subr.bf16.mxu0 (!%p416_p9), %v1184_v3  ;;  %v488_v12 = vld [vmem:[%s1696_s1 + $0xa8] sm:$0xff] (!%p416_p9)  ;;  %v1190_v13 = vpack.c.bf16 (!%p416_p9), %v470_v10, %v469_v9  ;;  %v471_v15 = vld [vmem:[%s1696_s1 + $0x20] sm:$0xff] (!%p416_p9)  ;;  %v489_v17 = vld [vmem:[%s1696_s1 + $0xb0] sm:$0xff] (!%p416_p9)  ;;  %1268 = vset.pattern.permute.xlu1 (!%p416_p9), %v1346_v52  ;;  %vm701_vm3 = vcmask (!%p416_p9), 64512   ;;  %vm873_vm4 = vcmask (!%p416_p9), 130048   ;;  %s458_s28 = sand.u32 (!%p416_p9), 1, %s1334_s30  }
  0x13   : > { %1187 = vmatpush3.bf16.msra.mxu0 (!%p416_p9), %v1186_v7  ;;  %v1192_v14 = vpack.c.bf16 (!%p416_p9), %v488_v12, %v487_v11  ;;  %v472_v16 = vld [vmem:[%s1696_s1 + $0x28] sm:$0xff] (!%p416_p9)  ;;  %v490_v18 = vld [vmem:[%s1696_s1 + $0xb8] sm:$0xff] (!%p416_p9)  ;;  %v473_v21 = vld [vmem:[%s1696_s1 + $0x30] sm:$0xff] (!%p416_p9)  ;;  %s1127_s18 = sshll.u32 (!%p416_p9), %s1445_s17, 7  ;;  %s1035_s19 = scalar_lea.sflag (!%p416_p9), [#allocation3], %s458_s28 }
  0x14   : > { %1189 = vmatprep.subr.bf16.mxu0 (!%p416_p9), %v1188_v8  ;;  %v1194_v19 = vpack.c.bf16 (!%p416_p9), %v472_v16, %v471_v15  ;;  %v1196_v20 = vpack.c.bf16 (!%p416_p9), %v490_v18, %v489_v17  ;;  %v474_v22 = vld [vmem:[%s1696_s1 + $0x38] sm:$0xff] (!%p416_p9)  ;;  %v491_v23 = vld [vmem:[%s1696_s1 + $0xc0] sm:$0xff] (!%p416_p9)  ;;  %v492_v24 = vld [vmem:[%s1696_s1 + $0xc8] sm:$0xff] (!%p416_p9) }
  0x15   : > { %v1198_v27 = vpack.c.bf16 (!%p416_p9), %v474_v22, %v473_v21  ;;  %v1200_v28 = vpack.c.bf16 (!%p416_p9), %v492_v24, %v491_v23  ;;  %v475_v29 = vld [vmem:[%s1696_s1 + $0x40] sm:$0xff] (!%p416_p9)  ;;  %v476_v30 = vld [vmem:[%s1696_s1 + $0x48] sm:$0xff] (!%p416_p9)  ;;  %v493_v31 = vld [vmem:[%s1696_s1 + $0xd0] sm:$0xff] (!%p416_p9) }
  0x16   : > { %v494_v32 = vld [vmem:[%s1696_s1 + $0xd8] sm:$0xff] (!%p416_p9)  ;;  %v1202_v33 = vpack.c.bf16 (!%p416_p9), %v476_v30, %v475_v29  ;;  %v477_v35 = vld [vmem:[%s1696_s1 + $0x50] sm:$0xff] (!%p416_p9)  ;;  %v495_v37 = vld [vmem:[%s1696_s1 + $0xe0] sm:$0xff] (!%p416_p9) }
  0x17   : > { %s462_s15 = scalar_select %p461_p10, %s1445_s17, 1  ;;  %1191 = vmatpush3.bf16.msra.mxu0 %v1190_v13  ;;  %v1204_v34 = vpack.c.bf16 %v494_v32, %v493_v31  ;;  %v478_v36 = vld [vmem:[%s1696_s1 + $0x58] sm:$0xff]  ;;  %v496_v38 = vld [vmem:[%s1696_s1 + $0xe8] sm:$0xff]  ;;  %v479_v41 = vld [vmem:[%s1696_s1 + $0x60] sm:$0xff] }
  0x18   : > { %1193 = vmatprep.subr.bf16.mxu0 %v1192_v14  ;;  %v1206_v39 = vpack.c.bf16 %v478_v36, %v477_v35  ;;  %v1208_v40 = vpack.c.bf16 %v496_v38, %v495_v37  ;;  %v480_v42 = vld [vmem:[%s1696_s1 + $0x68] sm:$0xff]  ;;  %v497_v43 = vld [vmem:[%s1696_s1 + $0xf0] sm:$0xff]  ;;  %v498_v44 = vld [vmem:[%s1696_s1 + $0xf8] sm:$0xff]  ;;  %s1348_s17 = smov [#allocation2]  }
  0x19   : > { %s1126_s25 = sshll.u32 %s462_s15, 3  ;;  %v1210_v45 = vpack.c.bf16 %v480_v42, %v479_v41  ;;  %v1212_v46 = vpack.c.bf16 %v498_v44, %v497_v43  ;;  %v481_v47 = vld [vmem:[%s1696_s1 + $0x70] sm:$0xff]  ;;  %v482_v48 = vld [vmem:[%s1696_s1 + $0x78] sm:$0xff]  ;;  %v573_v51 = vld [vmem:[%s1700_s5] sm:$0xff]  ;;  %s1284_s26 = sshll.u32 %s1348_s17, 4  ;;  %s1285_s26 = int_to_ptr.vmem [resolvable:$false] %s1284_s26 }
  0x1a   : > { %s465_s29 = scalar_lea.vmem %s1695_s0, %s1126_s25  ;;  %v1214_v49 = vpack.c.bf16 %v482_v48, %v481_v47  ;;  %v577_v53 = vld [vmem:[%s1704_s9] sm:$0xff]  ;;  %584 = vperm.xlu0 %1267, %v573_v51   ;;  %v871_v22 = vld [vmem:[%s1697_s2 + $0x10] sm:$0xff]  ;;  %v951_v35 = vld [vmem:[%s1698_s3 + $0x18] sm:$0xff]  ;;  %s1653_s25 = scalar_lea.hbm %s1709_s14, %s1127_s18 }
  0x1b   : > { %v1531_v25 = vld [vmem:[%s465_s29] sm:$0xff]  ;;  %1195 = vmatpush3.bf16.msra.mxu0 %v1194_v19  ;;  %v671_v54 = vadd.f32 1e-05, %v577_v53  ;;  %v870_v19 = vld [vmem:[%s1697_s2 + $0x8] sm:$0xff]  ;;  %s1112_s29 = sshll.u32 %s458_s28, 3  ;;  %s1286_s27 = scalar_lea.vmem %s1285_s26, 256 }
  0x1c   : > { %v500_v26 = vcombine.high %v1531_v25, %v1531_v25  ;;  %1197 = vmatprep.subr.bf16.mxu0 %v1196_v20  ;;  %v576_v55 = vld [vmem:[%s1703_s8] sm:$0xff]  ;;  %v872_v20 = vld [vmem:[%s1697_s2 + $0x18] sm:$0xff] }
  0x1d   : > { %1270 = vrsqrt.f32 %v671_v54  ;;  %v575_v56 = vld [vmem:[%s1702_s7] sm:$0xff]  ;;  %v1216_v23 = vpack.c.bf16 %v872_v20, %v870_v19 }
  0x1e   : > { %566 = vmatprep.mubr.f32.mxu0 %v500_v26  ;;  %667 = vperm.xlu0 %1267, %v576_v55   ;;  %v579_v57 = vld [vmem:[%s1706_s11] sm:$0xf] }
  0x1f   : > { %1199 = vmatpush3.bf16.msra.mxu0 %v1198_v27  ;;  %v574_v59 = vld [vmem:[%s1701_s6] sm:$0xff] }
  0x20   : > { %1201 = vmatprep.subr.bf16.mxu0 %v1200_v28  ;;  %v572_v63 = vld [vmem:[%s1699_s4] sm:$0xff] }
  0x21   : > { %v578_v17 = vld [vmem:[%s1705_s10] sm:$0xf] }
  0x22   : > { %687 = vperm.xlu0 %1267, %v575_v56   ;;  %v581_v18 = vld [vmem:[%s1708_s13] sm:$0xf] }
  0x23   : > { %1203 = vmatpush3.bf16.msra.mxu0 %v1202_v33  ;;  %v869_v21 = vld [vmem:[%s1697_s2] sm:$0xff] }
  0x24   : > { %1205 = vmatprep.subr.bf16.mxu0 %v1204_v34  ;;  %v580_v24 = vld [vmem:[%s1707_s12] sm:$0xf]  ;;  %v1218_v26 = vpack.c.bf16 %v871_v22, %v869_v21  ;;  %v949_v34 = vld [vmem:[%s1698_s3 + $0x8] sm:$0xff] }
  0x25   : > { %v1220_v36 = vpack.c.bf16 %v951_v35, %v949_v34 }
  0x26   : > { %698 = vperm.xlu0 %1267, %v579_v57  }
  0x27   : > { %1207 = vmatpush3.bf16.msra.mxu0 %v1206_v39  ;;  %v1271_v58 = vpop.eup %1270  ;;  %v948_v39 = vld [vmem:[%s1698_s3] sm:$0xff] }
  0x28   : > { %1209 = vmatprep.subr.bf16.mxu0 %v1208_v40  ;;  %675 = vperm.xlu1 %1268, %v1271_v58   ;;  %v950_v40 = vld [vmem:[%s1698_s3 + $0x10] sm:$0xff] }
  0x29   : > { %v1222_v41 = vpack.c.bf16 %v950_v40, %v948_v39 }
  0x2b   : > { %1211 = vmatpush3.bf16.msra.mxu0 %v1210_v45 }
  0x2c   : > { %1213 = vmatprep.subr.bf16.mxu0 %v1212_v46  ;;  %681 = vperm.xlu1 %1268, %v574_v59  }
  0x2f   : > { %1215 = vmatpush3.bf16.msra.mxu0 %v1214_v49 }
  0x32   : > { %567 = vmatmul.mubr.f32.vlgmr.msra.gmra.mrb[0].mxu0 %v1531_v25 }
  0x99   : > { %v585_v0 = vpop.permute.xlu0 %584 }
  0x9d   : > { %v668_v5 = vpop.permute.xlu0 %667 }
  0xa1   : > { %v688_v10 = vpop.permute.xlu0 %687 }
  0xa5   : > { %v699_v28 = vpop.permute.xlu0 %698 }
  0xa7   : > { %v676_v1 = vpop.permute.xlu1 %675 }
  0xab   : > { %v682_v8 = vpop.permute.xlu1 %681 }
 0x105   : > { %v1160_v60 = vpop.f32.mrb[0].mxu0 }
 0x106   : > { %v1161_v61 = vpop.f32.mrb[1].mxu0 }
 0x107   : > { %v1162_v62 = vadd.f32 %v1161_v61, %v1160_v60 }
 0x109   : > { %1170 = vmatpush3.msk.msra.mxu1 %vm591_vm1, %v1162_v62 }
 0x10a   : > { %1172 = vmatmul.mubr.msk.f32.vlgmr.msra.gmra.mrb[0].mxu1 %vm587_vm2, %v572_v63  ;;  %1174 = vmatprep.subr.mxu1 %v1344_v50 }
 0x10b   : > { %1176 = vmatprep.mubr.msk.f32.mxu1 %vm1345_vm0, %v1344_v50 }
 0x1dd   : > { %v661_v2 = vpop.f32.mrb[0].mxu1 }
 0x1de   : > { %v662_v3 = vadd.f32 %v661_v2, %v585_v0  ;;  %v1173_v4 = vpop.f32.mrb[1].mxu1 }
 0x1e0   : > { %v670_v6 = vsub.f32 %v662_v3, %v668_v5 }
 0x1e2   : > { %v678_v7 = vmul.f32 %v676_v1, %v670_v6 }
 0x1e4   : > { %v684_v9 = vmul.f32 %v682_v8, %v678_v7 }
 0x1e6   : > { %v690_v11 = vadd.f32 %v688_v10, %v684_v9 }
 0x1e8   : > { %v691_v12 = vadd.f32 3.0, %v690_v11 }
 0x1ea   : > { %v692_v13 = vmax.f32 %v691_v12, 0.0 }
 0x1ec   : > { %v693_v14 = vmin.f32 %v692_v13, 6.0 }
 0x1ee   : > { %v694_v15 = vmul.f32 0.16666667, %v693_v14 }
 0x1f0   : > { %v695_v16 = vmul.f32 %v694_v15, %v690_v11 }
 0x1f2   : > { %781 = vrot.lane.b32.xlu1 %v695_v16, %s1347_s20  ;;  %1175 = vmatpush3.msra.mxu1 %v695_v16  ;;  %s460_s20 = scalar_lea.vmem [#allocation2], %s1112_s29 }
 0x1f3   : > { %1177 = vmatmul.mubr.msk.f32.vlgmr.msra.gmra.mrb[2].mxu1 %vm701_vm3, %v578_v17  ;;  %1179 = vmatprep.subr.mxu1 %v1344_v50  ;;  %s1049_s22 = sshll.u32 %s460_s20, 4  ;;  %s1655_s22 = int_to_ptr.vmem [resolvable:$true] %s1049_s22 }
 0x1f4   : > { %1181 = vmatprep.mubr.msk.f32.mxu1 %vm1345_vm0, %v1344_v50  ;;  %s1280_s15 = scalar_lea.vmem %s1655_s22, 128  ;;  %p1287_p0 = scmp.lt.s32.totalorder %s1655_s22, %s1285_s26 }
 0x1f5   : > { %p1281_p11 = scmp.ne.s32.totalorder %s1655_s22, %s1280_s15  ;;  %p1288_p1 = scmp.lt.s32.totalorder %s1286_s27, %s1280_s15 }
 0x1f6   : > { %777 = vperm.xlu1 %1268, %v581_v18  }
 0x1f7   : > { %p1282_p12 = pnand %p1281_p11, %p1462_p5  ;;  %p1289_p2 = por %p1288_p1, %p1287_p0 }
 0x1f9   : > { %p1283_p13 = pneg %p1282_p12 }
 0x1fb   : > { %p1290_p3 = pnand %p1289_p2, %p1283_p13 }
 0x264   : > { %v782_v27 = vpop.permute.xlu1 %781 }
 0x265   : > { %1180 = vmatpush3.msra.mxu1 %v782_v27 }
 0x266   : > { %1182 = vmatmul.mubr.msk.f32.vlgmr.msra.gmra.mrb[4].mxu1 %vm701_vm3, %v580_v24  ;;  %1217 = vmatprep.subr.bf16.mxu1 %v1216_v23 }
 0x267   : > { %1219 = vmatpush1.bf16.msra.mxu1 %v1218_v26  ;;  %941 = vmatprep.mubr.f32.mxu1 %v1344_v50 }
 0x268   : > { %1221 = vmatprep.subr.bf16.mxu1 %v1220_v36 }
 0x275   : > { %v778_v43 = vpop.permute.xlu1 %777 }
 0x2c6   : > { %v771_v29 = vpop.f32.mrb[2].mxu1 }
 0x2c7   : > { %v772_v30 = vadd.f32 %v771_v29, %v699_v28  ;;  %v1178_v31 = vpop.f32.mrb[3].mxu1 }
 0x2c9   : > { %v857_v32 = vsub.f32 0.0, %v772_v30 }
 0x2cb   : > { %v858_v33 = vmul.f32 1.442695, %v857_v32 }
 0x2cd   : > { %1272 = vpow2.f32 %v858_v33 }
 0x2d7   : > { %v1273_v37 = vpop.eup %1272 }
 0x2d8   : > { %v860_v38 = vadd.f32 1.0, %v1273_v37 }
 0x2da   : > { %1274 = vrcp.f32 %v860_v38 }
 0x2e4   : > { %v1275_v42 = vpop.eup %1274 }
 0x2e5   : > { %1119 = vmatmul.mubr.msk.f32.vlgmr.msra.gmra.mrb[6].mxu1 %vm873_vm4, %v1275_v42 }
 0x2e6   : > { %1223 = vmatpush1.bf16.msra.mxu1 %v1222_v41  ;;  %1019 = vmatprep.mubr.f32.mxu1 %v1344_v50 }
 0x339   : > { %v853_v44 = vpop.f32.mrb[4].mxu1 }
 0x33a   : > { %v854_v45 = vadd.f32 %v853_v44, %v778_v43  ;;  %v1183_v46 = vpop.f32.mrb[5].mxu1 }
 0x33c   : > { %v863_v47 = vsub.f32 0.0, %v854_v45 }
 0x33e   : > { %v864_v48 = vmul.f32 1.442695, %v863_v47 }
 0x340   : > { %1276 = vpow2.f32 %v864_v48 }
 0x34a   : > { %v1277_v49 = vpop.eup %1276 }
 0x34b   : > { %v866_v51 = vadd.f32 1.0, %v1277_v49 }
 0x34d   : > { %1278 = vrcp.f32 %v866_v51 }
 0x357   : > { %v1279_v52 = vpop.eup %1278 }
 0x358   : > { %1120 = vmatmul.mubr.msk.f32.vlgmr.msra.gmra.mrb[8].mxu1 %vm873_vm4, %v1279_v52 }
 0x3b8   : > { %v943_v53 = vpop.f32.mrb[6].mxu1 }
 0x3b9   : > { %v945_v54 = vpop.f32.mrb[7].mxu1 }
 0x42b   : > { %v1021_v50 = vpop.f32.mrb[8].mxu1 }
 0x42c   : > { %v1026_v55 = vmul.f32 %v1021_v50, %v943_v53  ;;  %v1023_v56 = vpop.f32.mrb[9].mxu1 }
 0x42d   : > { %v1027_v57 = vmul.f32 %v1023_v56, %v945_v54 }
 0x42f   : > { %v1030_v58 = vcombine.low %v1026_v55, %v1027_v57 }
 0x431   : > { %v1032_v59 = vmul.f32 %v1030_v58, %v1531_v25 }
 0x433   : > { %1033 = vst [vmem:[%s460_s20] sm:$0xff] %v1032_v59 }
 0x434   : > { %1293 = shalt.err (!%p1290_p3)
}
 0x435   : > { %s1294_s28 = scalar_lea.hbm %s1653_s25, 128  ;;  %s1298_s20 = scalar_lea.hbm %s1709_s14, 256 }
 0x436   : > { %p1295_p4 = scmp.ne.s32.totalorder %s1653_s25, %s1294_s28  ;;  %p1299_p9 = scmp.lt.u32.totalorder %s1653_s25, %s1709_s14 }
 0x437   : > { %p1300_p10 = scmp.lt.u32.totalorder %s1298_s20, %s1294_s28  ;;  %p1302_p12 = scmp.lt.u32.totalorder %s1294_s28, %s1653_s25 }
 0x438   : > { %p1296_p7 = pnand %p1295_p4, %p1462_p5 }
 0x439   : > { %p1301_p11 = por %p1300_p10, %p1299_p9 }
 0x43a   : > { %p1297_p8 = pneg %p1296_p7 }
 0x43b   : > { %p1303_p13 = por %p1302_p12, %p1301_p11 }
 0x43d   : > { %p1304_p0 = pnand %p1303_p13, %p1297_p8 }
 0x43f   : > { %1307 = shalt.err (!%p1304_p0)
}
 0x440   : > { %1224 = dma.vmem_to_hbm [thread:$0]  (%p1462_p5), %s1655_s22, 128, %s1653_s25, %s1035_s19  }
 0x441 PF: > { %s1722_s15 = sld [smem:[#allocation5_spill]]  ;;  %p1230_p1 = scmp.ge.s32.totalorder %s1342_s16, 2 }
 0x443   : > { %p1227_p2 = pnand %p1230_p1, %p1466_p6 }
 0x447   : > { %s1061_s26 = sand.u32 1, %s1722_s15  }
 0x448   : > { %s1062_s27 = scalar_lea.sflag [#allocation3], %s1061_s26 }
 0x449   : > { %1325 = dma.done.wait (!%p1227_p2), %s1062_s27, 128  }
 0x44a   : > { %1327 = vsyncadd (!%p1227_p2), %s1062_s27, 4294967168  ;;  %s1724_s16 = sld [smem:[#allocation7_spill]]  ;;  %s1725_s28 = sld [smem:[#allocation6_spill]] }
 0x44b   : > { %s1726_s15 = sld [smem:[#allocation8_spill]]  ;;  %s1727_s29 = smov %s1334_s30 }
 0x450   : > { %p24_p3 = scmp.ge.s32.totalorder %s1724_s16, 4   ;;  %s1728_s30 = smov %s1725_s28 }
 0x452   :  { %26 = sbr.rel (!%p24_p3) target bundleno = 3 (0x3), region = 111 }
 0x459   :  { %1067 = vsyncpa [#allocation3], 1 }
 0x45a   :  { %1069 = vsyncpa [#allocation3 + $0x1], 1 }

</bundles_post_ra>
